<compile_context>
chip_gen: v6e
topology: v6e:2x2x1
jax: 0.10.0
libtpu: 0.0.40
codegen_flags: <defaults>
</compile_context>

<pallas_src>
import jax
import jax.numpy as jnp
from jax.experimental import pallas as pl
from jax.experimental.pallas import tpu as pltpu

HIDDEN = 64          # per-network hidden width (from the PyTorch module)
FUSED = 2 * HIDDEN   # 128: actor hidden ++ critic hidden -> one vreg lane-width
OUT_PAD = 128        # lane-dense output slab width (mu | value | zero padding)


# -----------------------------------------------------------------------------
# Kernel: one batch tile -> one padded [TB, 128] output slab
# -----------------------------------------------------------------------------
def _actor_critic_kernel(x_ref, w1_ref, b1_ref, w2_ref, b2_ref, w3_ref, b3_ref,
                         out_ref):
    x = x_ref[...]

    # Layer 1 (shared LHS): [TB, S] @ [S, 128] -> [TB, 128], one tanh pass.
    h = jnp.tanh(
        jnp.dot(x, w1_ref[...], preferred_element_type=jnp.float32) + b1_ref[...]
    )
    # Layer 2 (block-diagonal aw2 (+) cw2): [TB, 128] @ [128, 128].
    h = jnp.tanh(
        jnp.dot(h, w2_ref[...], preferred_element_type=jnp.float32) + b2_ref[...]
    )
    # Layer 3: [TB, 128] @ [128, 128]; lanes 0..A-1 = mu, lane A = value.
    out = jnp.dot(h, w3_ref[...], preferred_element_type=jnp.float32) + b3_ref[...]
    out_ref[...] = out.astype(out_ref.dtype)


# -----------------------------------------------------------------------------
# Wrapper
# -----------------------------------------------------------------------------
def _pick_batch_tile(b):
    """Largest power-of-two tile (<=1024, multiple of 8) that divides the batch."""
    for tb in (1024, 512, 256, 128, 64, 32, 16, 8):
        if b % tb == 0:
            return tb
    return b  # fallback (b already padded to a multiple of 8 by the wrapper)


@jax.jit
def actor_critic_forward(state, fused_params):
    """Fused actor/critic forward pass.

    Args:
      state:        [B, state_dim] float32
      fused_params: dict from `pack_params` (fused weights + log_std).

    Returns:
      (mu [B, action_dim], std [action_dim], value [B, 1])
    """
    B, state_dim = state.shape
    action_dim = fused_params["log_std"].shape[0]

    w1, b1 = fused_params["w1"], fused_params["b1"]
    w2, b2 = fused_params["w2"], fused_params["b2"]
    w3, b3 = fused_params["w3"], fused_params["b3"]

    # Pad the batch to a multiple of 8 sublanes (unmasked vld/vst everywhere).
    B_pad = ((B + 7) // 8) * 8
    x = state if B_pad == B else jnp.pad(state, ((0, B_pad - B), (0, 0)))

    tb = _pick_batch_tile(B_pad)
    grid = (B_pad // tb,)

    def resident(arr):
        # Weights/biases: same block every grid step -> stay VMEM-resident.
        return pl.BlockSpec(arr.shape, lambda i: (0, 0))

    cost = pl.CostEstimate(
        flops=2 * B_pad * (state_dim * FUSED + FUSED * FUSED + FUSED * OUT_PAD),
        transcendentals=2 * B_pad * FUSED,  # two tanh passes over [B, 128]
        bytes_accessed=4 * (B_pad * state_dim + B_pad * OUT_PAD
                            + state_dim * FUSED + FUSED * FUSED
                            + FUSED * OUT_PAD + 3 * OUT_PAD),
    )

    out = pl.pallas_call(
        _actor_critic_kernel,
        out_shape=jax.ShapeDtypeStruct((B_pad, OUT_PAD), jnp.float32),
        grid=grid,
        in_specs=[
            pl.BlockSpec((tb, state_dim), lambda i: (i, 0)),  # state tile
            resident(w1), resident(b1),
            resident(w2), resident(b2),
            resident(w3), resident(b3),
        ],
        out_specs=pl.BlockSpec((tb, OUT_PAD), lambda i: (i, 0)),
        compiler_params=pltpu.CompilerParams(
            dimension_semantics=("parallel",),
        ),
        cost_estimate=cost,
    )(x, w1, b1, w2, b2, w3, b3)

    out = out[:B]
    mu = out[:, :action_dim]
    value = out[:, action_dim:action_dim + 1]
    std = jnp.exp(fused_params["log_std"])  # state-independent; done outside kernel
    return mu, std, value


# -----------------------------------------------------------------------------
# Parameter init (raw, PyTorch-like) and fused packing
# -----------------------------------------------------------------------------
def init_params(key, state_dim, action_dim, hidden=HIDDEN):
    """Raw params, nn.Linear-style uniform(-1/sqrt(fan_in)); W stored [in, out]."""
    def linear(k, fan_in, fan_out):
        kw, kb = jax.random.split(k)
        bound = 1.0 / jnp.sqrt(jnp.float32(fan_in))
        w = jax.random.uniform(kw, (fan_in, fan_out), jnp.float32, -bound, bound)
        b = jax.random.uniform(kb, (1, fan_out), jnp.float32, -bound, bound)
        return w, b

    keys = jax.random.split(key, 6)
    aw1, ab1 = linear(keys[0], state_dim, hidden)
    aw2, ab2 = linear(keys[1], hidden, hidden)
    aw3, ab3 = linear(keys[2], hidden, action_dim)
    cw1, cb1 = linear(keys[3], state_dim, hidden)
    cw2, cb2 = linear(keys[4], hidden, hidden)
    cw3, cb3 = linear(keys[5], hidden, 1)
    log_std = jnp.zeros((action_dim,), jnp.float32)  # nn.Parameter(torch.zeros(action_dim))
    return dict(
        aw1=aw1, ab1=ab1, aw2=aw2, ab2=ab2, aw3=aw3, ab3=ab3,
        cw1=cw1, cb1=cb1, cw2=cw2, cb2=cb2, cw3=cw3, cb3=cb3,
        log_std=log_std,
    )


def pack_params(raw):
    """Pack actor+critic into 128-lane fused (block-diagonal) weights.

    Done ONCE outside the jitted forward so the kernel only sees fused tensors.
    """
    action_dim = raw["aw3"].shape[1]
    assert action_dim + 1 <= OUT_PAD, "action_dim + 1 must fit the 128-lane slab"

    # Layer 1: shared LHS -> simple horizontal concat.
    w1 = jnp.concatenate([raw["aw1"], raw["cw1"]], axis=1)          # [S, 128]
    b1 = jnp.concatenate([raw["ab1"], raw["cb1"]], axis=1)          # [1, 128]

    # Layer 2: block-diagonal (actor hidden in lanes 0..63, critic in 64..127).
    w2 = jnp.zeros((FUSED, FUSED), jnp.float32)
    w2 = w2.at[:HIDDEN, :HIDDEN].set(raw["aw2"])
    w2 = w2.at[HIDDEN:, HIDDEN:].set(raw["cw2"])
    b2 = jnp.concatenate([raw["ab2"], raw["cb2"]], axis=1)          # [1, 128]

    # Layer 3: mu in output lanes [0, action_dim), value in lane action_dim.
    w3 = jnp.zeros((FUSED, OUT_PAD), jnp.float32)
    w3 = w3.at[:HIDDEN, :action_dim].set(raw["aw3"])
    w3 = w3.at[HIDDEN:, action_dim:action_dim + 1].set(raw["cw3"])
    b3 = jnp.zeros((1, OUT_PAD), jnp.float32)
    b3 = b3.at[:, :action_dim].set(raw["ab3"])
    b3 = b3.at[:, action_dim:action_dim + 1].set(raw["cb3"])

    return dict(w1=w1, b1=b1, w2=w2, b2=b2, w3=w3, b3=b3,
                log_std=raw["log_std"])


# -----------------------------------------------------------------------------
# Pure-JAX reference for correctness checking
# -----------------------------------------------------------------------------
def reference_forward(state, raw):
    h = jnp.tanh(state @ raw["aw1"] + raw["ab1"])
    h = jnp.tanh(h @ raw["aw2"] + raw["ab2"])
    mu = h @ raw["aw3"] + raw["ab3"]
    g = jnp.tanh(state @ raw["cw1"] + raw["cb1"])
    g = jnp.tanh(g @ raw["cw2"] + raw["cb2"])
    value = g @ raw["cw3"] + raw["cb3"]
    std = jnp.exp(raw["log_std"])
    return mu, std, value


if __name__ == "__main__":
    key = jax.random.PRNGKey(0)
    k_param, k_state = jax.random.split(key)

    batch = 8
    state_dim = 32
    action_dim = 4

    raw_params = init_params(k_param, state_dim, action_dim)
    fused_params = pack_params(raw_params)
    state = jax.random.normal(k_state, (batch, state_dim), jnp.float32)

    mu, std, value = actor_critic_forward(state, fused_params)
    jax.block_until_ready((mu, std, value))

    mu_ref, std_ref, value_ref = reference_forward(state, raw_params)
    assert mu.shape == (batch, action_dim)
    assert std.shape == (action_dim,)
    assert value.shape == (batch, 1)
    assert jnp.allclose(mu, mu_ref, atol=1e-5), "mu mismatch"
    assert jnp.allclose(std, std_ref, atol=1e-6), "std mismatch"
    assert jnp.allclose(value, value_ref, atol=1e-5), "value mismatch"

    print("KERNEL_OK")
</pallas_src>

<mosaic_0001>
module attributes {stable_mosaic.version = 11 : i64} {
  func.func @_actor_critic_kernel(%arg0: i32, %arg1: memref<8x32xf32, #tpu.memory_space<vmem>>, %arg2: memref<32x128xf32, #tpu.memory_space<vmem>>, %arg3: memref<1x128xf32, #tpu.memory_space<vmem>>, %arg4: memref<128x128xf32, #tpu.memory_space<vmem>>, %arg5: memref<1x128xf32, #tpu.memory_space<vmem>>, %arg6: memref<128x128xf32, #tpu.memory_space<vmem>>, %arg7: memref<1x128xf32, #tpu.memory_space<vmem>>, %arg8: memref<8x128xf32, #tpu.memory_space<vmem>>) attributes {dimension_semantics = [#tpu.dimension_semantics<parallel>], iteration_bounds = array<i64: 1>, scalar_prefetch = 0 : i64, scratch_operands = 0 : i64, tpu.core_type = #tpu.core_type<tc>, window_params = [{transform_indices = @transform_0, window_bounds = array<i64: 8, 32>}, {pipeline_mode = #tpu.pipeline_mode<synchronous>, transform_indices = @transform_1, window_bounds = array<i64: 32, 128>}, {pipeline_mode = #tpu.pipeline_mode<synchronous>, transform_indices = @transform_2, window_bounds = array<i64: 1, 128>}, {pipeline_mode = #tpu.pipeline_mode<synchronous>, transform_indices = @transform_3, window_bounds = array<i64: 128, 128>}, {pipeline_mode = #tpu.pipeline_mode<synchronous>, transform_indices = @transform_4, window_bounds = array<i64: 1, 128>}, {pipeline_mode = #tpu.pipeline_mode<synchronous>, transform_indices = @transform_5, window_bounds = array<i64: 128, 128>}, {pipeline_mode = #tpu.pipeline_mode<synchronous>, transform_indices = @transform_6, window_bounds = array<i64: 1, 128>}, {transform_indices = @transform_7, window_bounds = array<i64: 8, 128>}]} {
    %c0 = arith.constant 0 : index
    %c0_0 = arith.constant 0 : index
    %0 = vector.load %arg1[%c0, %c0_0] : memref<8x32xf32, #tpu.memory_space<vmem>>, vector<8x32xf32>
    %c0_1 = arith.constant 0 : index
    %c0_2 = arith.constant 0 : index
    %1 = vector.load %arg2[%c0_1, %c0_2] : memref<32x128xf32, #tpu.memory_space<vmem>>, vector<32x128xf32>
    %cst = arith.constant dense<0.000000e+00> : vector<8x128xf32>
    %2 = tpu.matmul %0, %1, %cst {dimension_numbers = #tpu.dot_dimension_numbers<[1], [0], [0], [1], [0, 0, 1, 1], [], []>} : vector<8x32xf32>, vector<32x128xf32>, vector<8x128xf32> -> vector<8x128xf32>
    %c0_3 = arith.constant 0 : index
    %c0_4 = arith.constant 0 : index
    %3 = vector.load %arg3[%c0_3, %c0_4] : memref<1x128xf32, #tpu.memory_space<vmem>>, vector<1x128xf32>
    %4 = vector.broadcast %3 : vector<1x128xf32> to vector<8x128xf32>
    %5 = arith.addf %2, %4 : vector<8x128xf32>
    %6 = math.tanh %5 : vector<8x128xf32>
    %c0_5 = arith.constant 0 : index
    %c0_6 = arith.constant 0 : index
    %7 = vector.load %arg4[%c0_5, %c0_6] : memref<128x128xf32, #tpu.memory_space<vmem>>, vector<128x128xf32>
    %cst_7 = arith.constant dense<0.000000e+00> : vector<8x128xf32>
    %8 = tpu.matmul %6, %7, %cst_7 {dimension_numbers = #tpu.dot_dimension_numbers<[1], [0], [0], [1], [0, 0, 1, 1], [], []>} : vector<8x128xf32>, vector<128x128xf32>, vector<8x128xf32> -> vector<8x128xf32>
    %c0_8 = arith.constant 0 : index
    %c0_9 = arith.constant 0 : index
    %9 = vector.load %arg5[%c0_8, %c0_9] : memref<1x128xf32, #tpu.memory_space<vmem>>, vector<1x128xf32>
    %10 = vector.broadcast %9 : vector<1x128xf32> to vector<8x128xf32>
    %11 = arith.addf %8, %10 : vector<8x128xf32>
    %12 = math.tanh %11 : vector<8x128xf32>
    %c0_10 = arith.constant 0 : index
    %c0_11 = arith.constant 0 : index
    %13 = vector.load %arg6[%c0_10, %c0_11] : memref<128x128xf32, #tpu.memory_space<vmem>>, vector<128x128xf32>
    %cst_12 = arith.constant dense<0.000000e+00> : vector<8x128xf32>
    %14 = tpu.matmul %12, %13, %cst_12 {dimension_numbers = #tpu.dot_dimension_numbers<[1], [0], [0], [1], [0, 0, 1, 1], [], []>} : vector<8x128xf32>, vector<128x128xf32>, vector<8x128xf32> -> vector<8x128xf32>
    %c0_13 = arith.constant 0 : index
    %c0_14 = arith.constant 0 : index
    %15 = vector.load %arg7[%c0_13, %c0_14] : memref<1x128xf32, #tpu.memory_space<vmem>>, vector<1x128xf32>
    %16 = vector.broadcast %15 : vector<1x128xf32> to vector<8x128xf32>
    %17 = arith.addf %14, %16 : vector<8x128xf32>
    %c0_15 = arith.constant 0 : index
    %c0_16 = arith.constant 0 : index
    %18 = vector.load %arg8[%c0_15, %c0_16] : memref<8x128xf32, #tpu.memory_space<vmem>>, vector<8x128xf32>
    tpu.vector_store %arg8[%c0_15, %c0_16], %17 {strides = array<i32>} : memref<8x128xf32, #tpu.memory_space<vmem>>, vector<8x128xf32>,
    return
  }
  func.func @transform_0(%arg0: i32) -> (i32, i32) {
    %c0_i32 = arith.constant 0 : i32
    %c0_i32_0 = arith.constant 0 : i32
    return %arg0, %c0_i32 : i32, i32
  }
  func.func @transform_1(%arg0: i32) -> (i32, i32) {
    %c0_i32 = arith.constant 0 : i32
    %c0_i32_0 = arith.constant 0 : i32
    %c0_i32_1 = arith.constant 0 : i32
    return %c0_i32, %c0_i32_0 : i32, i32
  }
  func.func @transform_2(%arg0: i32) -> (i32, i32) {
    %c0_i32 = arith.constant 0 : i32
    %c0_i32_0 = arith.constant 0 : i32
    %c0_i32_1 = arith.constant 0 : i32
    return %c0_i32, %c0_i32_0 : i32, i32
  }
  func.func @transform_3(%arg0: i32) -> (i32, i32) {
    %c0_i32 = arith.constant 0 : i32
    %c0_i32_0 = arith.constant 0 : i32
    %c0_i32_1 = arith.constant 0 : i32
    return %c0_i32, %c0_i32_0 : i32, i32
  }
  func.func @transform_4(%arg0: i32) -> (i32, i32) {
    %c0_i32 = arith.constant 0 : i32
    %c0_i32_0 = arith.constant 0 : i32
    %c0_i32_1 = arith.constant 0 : i32
    return %c0_i32, %c0_i32_0 : i32, i32
  }
  func.func @transform_5(%arg0: i32) -> (i32, i32) {
    %c0_i32 = arith.constant 0 : i32
    %c0_i32_0 = arith.constant 0 : i32
    %c0_i32_1 = arith.constant 0 : i32
    return %c0_i32, %c0_i32_0 : i32, i32
  }
  func.func @transform_6(%arg0: i32) -> (i32, i32) {
    %c0_i32 = arith.constant 0 : i32
    %c0_i32_0 = arith.constant 0 : i32
    %c0_i32_1 = arith.constant 0 : i32
    return %c0_i32, %c0_i32_0 : i32, i32
  }
  func.func @transform_7(%arg0: i32) -> (i32, i32) {
    %c0_i32 = arith.constant 0 : i32
    %c0_i32_0 = arith.constant 0 : i32
    return %arg0, %c0_i32 : i32, i32
  }
}

</mosaic_0001>

<bundles_post_ra>
// kernel: actor_critic_forward.1
= control target key start
LH: loop header
LB: loop body
LE: loop exit
PB: predicated region body
PF: predicated region fallthrough
CT: control target
= control target key end

     0   :  { %12 = vsyncpa [#allocation3], 0  ;;  %s706_s0 = inlined_call_operand.hbm [shape: f32[8,32], index: 0, kind: input, shape index: {}]   ;;  %s707_s1 = inlined_call_operand.hbm [shape: f32[32,128], index: 1, kind: input, shape index: {}]   ;;  %s708_s2 = inlined_call_operand.vmem [shape: f32[1,128], index: 2, kind: input, shape index: {}]   ;;  %s709_s3 = inlined_call_operand.hbm [shape: f32[128,128], index: 3, kind: input, shape index: {}]   ;;  %s710_s4 = inlined_call_operand.vmem [shape: f32[1,128], index: 4, kind: input, shape index: {}]   ;;  %s711_s5 = inlined_call_operand.hbm [shape: f32[128,128], index: 5, kind: input, shape index: {}]   ;;  %s712_s6 = inlined_call_operand.vmem [shape: f32[1,128], index: 6, kind: input, shape index: {}]   ;;  %s713_s7 = inlined_call_operand.vmem [shape: f32[8,128], index: 7, kind: output, shape index: {}]  }
   0x1   :  { %13 = vsyncpa [#allocation5], 0 }
   0x2   :  { %14 = vsyncpa [#allocation8], 0  ;;  %s583_s24 = smov [#allocation4]  }
   0x3   :  { %s30_s25 = sshll.u32 %s583_s24, 4  ;;  %s31_s25 = int_to_ptr.vmem [resolvable:$true] %s30_s25 }
   0x4   :  { %s505_s26 = scalar_lea.vmem %s31_s25, 512  ;;  %p510_p1 = scmp.lt.s32.totalorder %s31_s25, %s31_s25 }
   0x5   :  { %p506_p0 = scmp.ne.s32.totalorder %s31_s25, %s505_s26  ;;  %p511_p2 = scmp.lt.s32.totalorder %s505_s26, %s505_s26 }
   0x7   :  { %p512_p3 = por %p511_p2, %p510_p1 }
   0x9   :  { %p513_p4 = pnand %p512_p3, %p506_p0 }
   0xb   :  { %516 = shalt.err (!%p513_p4)
}
   0xc   :  { %s584_s27 = smov 128   ;;  %s585_s28 = smov 8  }
   0xd   :  { %36 = dma.hbm_to_vmem [thread:$0]  %s707_s1, 512, %s31_s25, [#allocation5], %s584_s27, %s584_s27, %s585_s28  }
   0xe   :  { %s586_s8 = smov [#allocation2]   ;;  %s587_s10 = smov [#allocation6]  }
   0xf   :  { %s21_s9 = sshll.u32 %s586_s8, 4  ;;  %s44_s11 = sshll.u32 %s587_s10, 4  ;;  %s22_s9 = int_to_ptr.vmem [resolvable:$true] %s21_s9  ;;  %s45_s11 = int_to_ptr.vmem [resolvable:$true] %s44_s11 }
  0x10   :  { %s525_s12 = scalar_lea.vmem %s22_s9, 128  ;;  %p530_p6 = scmp.lt.s32.totalorder %s22_s9, %s22_s9 }
  0x11   :  { %p526_p5 = scmp.ne.s32.totalorder %s22_s9, %s525_s12  ;;  %p531_p7 = scmp.lt.s32.totalorder %s525_s12, %s525_s12 }
  0x13   :  { %p532_p8 = por %p531_p7, %p530_p6 }
  0x15   :  { %p533_p9 = pnand %p532_p8, %p526_p5 }
  0x17   :  { %536 = shalt.err (!%p533_p9)
}
  0x18   :  { %24 = dma.hbm_to_vmem [thread:$0]  %s706_s0, 128, %s22_s9, [#allocation3]  }
  0x19   :  { %s545_s15 = scalar_lea.vmem %s45_s11, 2048  ;;  %p550_p11 = scmp.lt.s32.totalorder %s45_s11, %s45_s11 }
  0x1a   :  { %p546_p10 = scmp.ne.s32.totalorder %s45_s11, %s545_s15  ;;  %p551_p12 = scmp.lt.s32.totalorder %s545_s15, %s545_s15 }
  0x1c   :  { %p552_p13 = por %p551_p12, %p550_p11 }
  0x1e   :  { %p553_p0 = pnand %p552_p13, %p546_p10 }
  0x20   :  { %556 = shalt.err (!%p553_p0)
}
  0x21   :  { %50 = dma.hbm_to_vmem [thread:$0]  %s709_s3, 2048, %s45_s11, [#allocation5], %s584_s27, %s584_s27, %s585_s28  }
  0x22   :  { %s588_s17 = smov [#allocation7]  }
  0x23   :  { %s58_s18 = sshll.u32 %s588_s17, 4  ;;  %s59_s18 = int_to_ptr.vmem [resolvable:$true] %s58_s18 }
  0x24   :  { %s565_s19 = scalar_lea.vmem %s59_s18, 2048  ;;  %p570_p2 = scmp.lt.s32.totalorder %s59_s18, %s59_s18 }
  0x25   :  { %p566_p1 = scmp.ne.s32.totalorder %s59_s18, %s565_s19  ;;  %p571_p3 = scmp.lt.s32.totalorder %s565_s19, %s565_s19 }
  0x27   :  { %p572_p4 = por %p571_p3, %p570_p2 }
  0x29   :  { %p573_p5 = pnand %p572_p4, %p566_p1 }
  0x2b   :  { %576 = shalt.err (!%p573_p5)
}
  0x2c   :  { %64 = dma.hbm_to_vmem [thread:$0]  %s711_s5, 2048, %s59_s18, [#allocation8], %s584_s27, %s584_s27, %s585_s28  }
  0x2d   :  { %577 = dma.done.wait [#allocation3], 128  }
  0x2e   :  { %578 = vsyncadd [#allocation3], 4294967168 }
  0x2f   :  { %579 = dma.done.wait [#allocation5], 2560  }
  0x30   :  { %580 = vsyncadd [#allocation5], 4294964736 }
  0x31   :  { %581 = dma.done.wait [#allocation8], 2048  }
  0x32   :  { %582 = vsyncadd [#allocation8], 4294965248  ;;  %v589_v0 = vmov 0.0   ;;  %vm590_vm0 = vmmov 0   ;;  %v83_v1 = vld [vmem:[#allocation4 + $0x18] sm:$0xff]  ;;  %v82_v2 = vld [vmem:[#allocation4 + $0x10] sm:$0xff] }
  0x33   :  { %404 = vmatprep.subr.mxu0 %v589_v0  ;;  %412 = vmatprep.mubr.msk.f32.mxu0 %vm590_vm0, %v589_v0  ;;  %v181_v3 = vld [vmem:[#allocation6 + $0x78] sm:$0xff]  ;;  %v81_v4 = vld [vmem:[#allocation4 + $0x8] sm:$0xff]  ;;  %v180_v5 = vld [vmem:[#allocation6 + $0x70] sm:$0xff]  ;;  %vm91_vm1 = vcmask 261120  }
  0x34   :  { %415 = vmatprep.subr.mxu1 %v589_v0  ;;  %447 = vmatprep.mubr.msk.f32.mxu1 %vm590_vm0, %v589_v0  ;;  %v179_v6 = vld [vmem:[#allocation6 + $0x68] sm:$0xff]  ;;  %v80_v7 = vld [vmem:[#allocation4] sm:$0xff]  ;;  %v79_v8 = vld [vmem:[#allocation2] sm:$0xff] }
  0x35   :  { %405 = vmatpush3.msra.mxu0 %v83_v1  ;;  %416 = vmatpush3.msra.mxu1 %v181_v3  ;;  %v178_v9 = vld [vmem:[#allocation6 + $0x60] sm:$0xff]  ;;  %v177_v10 = vld [vmem:[#allocation6 + $0x58] sm:$0xff]  ;;  %v176_v11 = vld [vmem:[#allocation6 + $0x50] sm:$0xff] }
  0x36   :  { %406 = vmatprep.subr.mxu0 %v589_v0  ;;  %417 = vmatprep.subr.mxu1 %v589_v0  ;;  %v175_v12 = vld [vmem:[#allocation6 + $0x48] sm:$0xff]  ;;  %v174_v13 = vld [vmem:[#allocation6 + $0x40] sm:$0xff]  ;;  %v173_v14 = vld [vmem:[#allocation6 + $0x38] sm:$0xff] }
  0x37   :  { %407 = vmatpush3.msra.mxu0 %v82_v2  ;;  %418 = vmatpush3.msra.mxu1 %v180_v5  ;;  %v172_v15 = vld [vmem:[#allocation6 + $0x30] sm:$0xff]  ;;  %v171_v16 = vld [vmem:[#allocation6 + $0x28] sm:$0xff]  ;;  %v170_v17 = vld [vmem:[#allocation6 + $0x20] sm:$0xff] }
  0x38   :  { %408 = vmatprep.subr.mxu0 %v589_v0  ;;  %419 = vmatprep.subr.mxu1 %v589_v0  ;;  %v169_v18 = vld [vmem:[#allocation6 + $0x18] sm:$0xff]  ;;  %v168_v19 = vld [vmem:[#allocation6 + $0x10] sm:$0xff]  ;;  %v167_v20 = vld [vmem:[#allocation6 + $0x8] sm:$0xff] }
  0x39   :  { %409 = vmatpush3.msra.mxu0 %v81_v4  ;;  %420 = vmatpush3.msra.mxu1 %v179_v6  ;;  %v166_v21 = vld [vmem:[#allocation6] sm:$0xff]  ;;  %v275_v22 = vld [vmem:[#allocation7 + $0x78] sm:$0xff]  ;;  %v274_v23 = vld [vmem:[#allocation7 + $0x70] sm:$0xff] }
  0x3a   :  { %410 = vmatprep.subr.mxu0 %v589_v0  ;;  %421 = vmatprep.subr.mxu1 %v589_v0  ;;  %v273_v24 = vld [vmem:[#allocation7 + $0x68] sm:$0xff]  ;;  %v272_v25 = vld [vmem:[#allocation7 + $0x60] sm:$0xff]  ;;  %v271_v26 = vld [vmem:[#allocation7 + $0x58] sm:$0xff] }
  0x3b   :  { %411 = vmatpush3.msra.mxu0 %v80_v7  ;;  %422 = vmatpush3.msra.mxu1 %v178_v9  ;;  %v270_v27 = vld [vmem:[#allocation7 + $0x50] sm:$0xff]  ;;  %v269_v28 = vld [vmem:[#allocation7 + $0x48] sm:$0xff]  ;;  %v361_v29 = vld [vmem:[%s708_s2] ss:$0 sm:$0xff] }
  0x3c   :  { %413 = vmatmul.mubr.msk.f32.vlgmr.msra.gmra.mxu0 %vm91_vm1, %v79_v8  ;;  %423 = vmatprep.subr.mxu1 %v589_v0  ;;  %v268_v34 = vld [vmem:[#allocation7 + $0x40] sm:$0xff]  ;;  %v267_v35 = vld [vmem:[#allocation7 + $0x38] sm:$0xff]  ;;  %v266_v36 = vld [vmem:[#allocation7 + $0x30] sm:$0xff] }
  0x3d   :  { %450 = vmatprep.subr.mxu0 %v589_v0  ;;  %424 = vmatpush3.msra.mxu1 %v177_v10  ;;  %v265_v37 = vld [vmem:[#allocation7 + $0x28] sm:$0xff]  ;;  %v264_v38 = vld [vmem:[#allocation7 + $0x20] sm:$0xff]  ;;  %v263_v39 = vld [vmem:[#allocation7 + $0x18] sm:$0xff] }
  0x3e   :  { %482 = vmatprep.mubr.msk.f32.mxu0 %vm590_vm0, %v589_v0  ;;  %425 = vmatprep.subr.mxu1 %v589_v0  ;;  %v262_v40 = vld [vmem:[#allocation7 + $0x10] sm:$0xff]  ;;  %v261_v41 = vld [vmem:[#allocation7 + $0x8] sm:$0xff]  ;;  %v260_v42 = vld [vmem:[#allocation7] sm:$0xff] }
  0x3f   :  { %426 = vmatpush3.msra.mxu1 %v176_v11  ;;  %451 = vmatpush3.msra.mxu0 %v275_v22  ;;  %v363_v43 = vld [vmem:[%s710_s4] ss:$0 sm:$0xff] }
  0x40   :  { %427 = vmatprep.subr.mxu1 %v589_v0  ;;  %452 = vmatprep.subr.mxu0 %v589_v0  ;;  %v364_v48 = vld [vmem:[%s712_s6] ss:$0 sm:$0xff] }
  0x41   :  { %428 = vmatpush3.msra.mxu1 %v175_v12  ;;  %453 = vmatpush3.msra.mxu0 %v274_v23 }
  0x42   :  { %429 = vmatprep.subr.mxu1 %v589_v0  ;;  %454 = vmatprep.subr.mxu0 %v589_v0 }
  0x43   :  { %430 = vmatpush3.msra.mxu1 %v174_v13  ;;  %455 = vmatpush3.msra.mxu0 %v273_v24 }
  0x44   :  { %431 = vmatprep.subr.mxu1 %v589_v0  ;;  %456 = vmatprep.subr.mxu0 %v589_v0 }
  0x45   :  { %432 = vmatpush3.msra.mxu1 %v173_v14  ;;  %457 = vmatpush3.msra.mxu0 %v272_v25 }
  0x46   :  { %433 = vmatprep.subr.mxu1 %v589_v0  ;;  %458 = vmatprep.subr.mxu0 %v589_v0 }
  0x47   :  { %434 = vmatpush3.msra.mxu1 %v172_v15  ;;  %459 = vmatpush3.msra.mxu0 %v271_v26 }
  0x48   :  { %435 = vmatprep.subr.mxu1 %v589_v0  ;;  %460 = vmatprep.subr.mxu0 %v589_v0 }
  0x49   :  { %436 = vmatpush3.msra.mxu1 %v171_v16  ;;  %461 = vmatpush3.msra.mxu0 %v270_v27 }
  0x4a   :  { %437 = vmatprep.subr.mxu1 %v589_v0  ;;  %462 = vmatprep.subr.mxu0 %v589_v0 }
  0x4b   :  { %438 = vmatpush3.msra.mxu1 %v170_v17  ;;  %463 = vmatpush3.msra.mxu0 %v269_v28 }
  0x4c   :  { %439 = vmatprep.subr.mxu1 %v589_v0  ;;  %464 = vmatprep.subr.mxu0 %v589_v0 }
  0x4d   :  { %440 = vmatpush3.msra.mxu1 %v169_v18  ;;  %465 = vmatpush3.msra.mxu0 %v268_v34 }
  0x4e   :  { %441 = vmatprep.subr.mxu1 %v589_v0  ;;  %466 = vmatprep.subr.mxu0 %v589_v0 }
  0x4f   :  { %442 = vmatpush3.msra.mxu1 %v168_v19  ;;  %467 = vmatpush3.msra.mxu0 %v267_v35 }
  0x50   :  { %443 = vmatprep.subr.mxu1 %v589_v0  ;;  %468 = vmatprep.subr.mxu0 %v589_v0 }
  0x51   :  { %444 = vmatpush3.msra.mxu1 %v167_v20  ;;  %469 = vmatpush3.msra.mxu0 %v266_v36 }
  0x52   :  { %445 = vmatprep.subr.mxu1 %v589_v0  ;;  %470 = vmatprep.subr.mxu0 %v589_v0 }
  0x53   :  { %446 = vmatpush3.msra.mxu1 %v166_v21  ;;  %471 = vmatpush3.msra.mxu0 %v265_v37 }
  0x54   :  { %472 = vmatprep.subr.mxu0 %v589_v0 }
  0x55   :  { %473 = vmatpush3.msra.mxu0 %v264_v38 }
  0x56   :  { %474 = vmatprep.subr.mxu0 %v589_v0 }
  0x57   :  { %475 = vmatpush3.msra.mxu0 %v263_v39 }
  0x58   :  { %476 = vmatprep.subr.mxu0 %v589_v0 }
  0x59   :  { %477 = vmatpush3.msra.mxu0 %v262_v40 }
  0x5a   :  { %478 = vmatprep.subr.mxu0 %v589_v0 }
  0x5b   :  { %479 = vmatpush3.msra.mxu0 %v261_v41 }
  0x5c   :  { %480 = vmatprep.subr.mxu0 %v589_v0 }
  0x5d   :  { %481 = vmatpush3.msra.mxu0 %v260_v42 }
  0xfc   :  { %v161_v30 = vpop.f32.mrf.mxu0 }
  0xfd   :  { %v162_v31 = vadd.f32 %v361_v29, %v161_v30 }
  0xfe   :  { %v414_v32 = vpop.f32.mrf.mxu0 }
  0xff   :  { %493 = vtanh.f32 %v162_v31 }
 0x10c   :  { %v494_v33 = vpop.eup %493 }
 0x10d   :  { %448 = vmatmul.mubr.f32.vlgmr.msra.gmra.mxu1 %v494_v33 }
 0x1cd   :  { %v255_v44 = vpop.f32.mrf.mxu1 }
 0x1ce   :  { %v256_v45 = vadd.f32 %v363_v43, %v255_v44 }
 0x1cf   :  { %v449_v46 = vpop.f32.mrf.mxu1 }
 0x1d0   :  { %495 = vtanh.f32 %v256_v45 }
 0x1dd   :  { %v496_v47 = vpop.eup %495 }
 0x1de   :  { %483 = vmatmul.mubr.f32.vlgmr.msra.gmra.mxu0 %v496_v47 }
 0x29e   :  { %v349_v49 = vpop.f32.mrf.mxu0 }
 0x29f   :  { %v350_v50 = vadd.f32 %v364_v48, %v349_v49 }
 0x2a0   :  { %v484_v51 = vpop.f32.mrf.mxu0 }
 0x2a1   :  { %353 = vst [vmem:[%s713_s7] sm:$0xff] %v350_v50 }
 0x2a2   :  { %358 = vsyncpa [#allocation3], 1 }
 0x2a3   :  { %359 = vsyncpa [#allocation5], 1 }
 0x2a4   :  { %360 = vsyncpa [#allocation8], 1 }

</bundles_post_ra>
